<compile_context>
chip_gen: v5e
topology: v5e:2x2
jax: 0.10.0
libtpu: 0.0.40
codegen_flags: <defaults>
</compile_context>

<pallas_src>
from functools import partial

import jax
import jax.numpy as jnp
from jax.experimental import pallas as pl
from jax.experimental.pallas import tpu as pltpu


def _round_up(x, m):
    return ((x + m - 1) // m) * m


def _vmem_cap_bytes():
    """~75% of physical VMEM if discoverable, else a cap safe on all generations."""
    try:
        info = pltpu.get_tpu_info()
        cap = getattr(info, "vmem_capacity_bytes", None)
        if cap:
            return int(cap) * 3 // 4
    except Exception:
        pass
    return 48 << 20  # safe even on v7x (64 MiB physical VMEM)


def oracle_kernel(x_ref, w1_ref, s_ref, b1_ref, w2_ref, b2_ref, o_ref):
    # Linear #1: f32 x tile cast to bf16 on the VPU, MXU matmul, f32 accumulation.
    x = x_ref[...].astype(jnp.bfloat16)
    h = jnp.dot(x, w1_ref[...], preferred_element_type=jnp.float32)
    # BatchNorm1d (eval) affine in f32: scale kept out of the bf16 weights.
    h = h * s_ref[...] + b1_ref[...]
    # Dropout(0.4) is identity in eval mode.
    h = jnp.where(h >= 0, h, 0.2 * h)        # LeakyReLU(0.2), f32 on the VPU
    # Linear #2.
    y = jnp.dot(h.astype(jnp.bfloat16), w2_ref[...], preferred_element_type=jnp.float32)
    o_ref[...] = (y + b2_ref[...]).astype(o_ref.dtype)


@partial(jax.jit, static_argnames=("tile_n",))
def oracle_forward(x, w1, b1, gamma, beta, running_mean, running_var, eps, w2, b2,
                   *, tile_n=1024):
    """x: (N, D_in) f32.  w1: (D_hid, D_in), w2: (D_out, D_hid) (PyTorch layout).

    Returns (N, D_out) in bfloat16 (MXU-precision pipeline, f32 accumulation).
    """
    n, d_in = x.shape
    d_hid = w1.shape[0]
    d_out = w2.shape[0]

    # ---- host-side prep (tiny, weight-sized only; x is untouched) ----
    scale = gamma / jnp.sqrt(running_var + eps)                 # (D_hid,) f32
    b1_eff = (b1 - running_mean) * scale + beta                 # folded shift, f32
    w1_t = w1.T.astype(jnp.bfloat16)                            # (D_in, D_hid)
    w2_t = w2.T.astype(jnp.bfloat16)                            # (D_hid, D_out)
    scale2d = scale.reshape(1, d_hid).astype(jnp.float32)
    b1_2d = b1_eff.reshape(1, d_hid).astype(jnp.float32)
    b2_2d = b2.reshape(1, d_out).astype(jnp.float32)

    # ---- tile-size selection ----
    lanes_in = _round_up(d_in, 128)
    lanes_h = _round_up(d_hid, 128)
    lanes_o = _round_up(d_out, 128)

    # Double-buffered per-row VMEM footprint of the pipelined operands (x f32, out bf16).
    row_bytes = 2 * (lanes_in * 4 + lanes_o * 2)
    tile_cap = max(8, ((12 << 20) // row_bytes) // 8 * 8)
    # >= 2 grid steps for moderate n (v7x megacore), multiple of 8 rows.
    two_way = _round_up(-(-n // 2), 8)
    tile_n = max(8, (min(tile_n, two_way, tile_cap) // 8) * 8)

    grid = (pl.cdiv(n, tile_n),)

    # ---- VMEM budget (each operand double-buffered once; no double counting) ----
    w_bytes = (_round_up(d_in, 16) * lanes_h + _round_up(d_hid, 16) * lanes_o) * 2  # bf16 weights
    vec_bytes = (2 * 8 * lanes_h + 8 * lanes_o) * 4                                  # scale, b1, b2 (f32)
    tile_bytes = tile_n * (lanes_in * 4 + lanes_o * 2)                               # one x + one out tile
    vmem_need = 2 * (w_bytes + vec_bytes + tile_bytes)
    vmem_limit = min(max(int(vmem_need) + (4 << 20), 16 << 20), _vmem_cap_bytes())

    y = pl.pallas_call(
        oracle_kernel,
        out_shape=jax.ShapeDtypeStruct((n, d_out), jnp.bfloat16),
        grid_spec=pltpu.PrefetchScalarGridSpec(
            num_scalar_prefetch=0,
            grid=grid,
            in_specs=[
                pl.BlockSpec((tile_n, d_in), lambda i: (i, 0)),    # x tile (f32, pipelined)
                pl.BlockSpec((d_in, d_hid), lambda i: (0, 0)),     # W1^T (bf16, resident)
                pl.BlockSpec((1, d_hid), lambda i: (0, 0)),        # BN scale (f32)
                pl.BlockSpec((1, d_hid), lambda i: (0, 0)),        # folded bias #1 (f32)
                pl.BlockSpec((d_hid, d_out), lambda i: (0, 0)),    # W2^T (bf16, resident)
                pl.BlockSpec((1, d_out), lambda i: (0, 0)),        # bias #2 (f32)
            ],
            out_specs=pl.BlockSpec((tile_n, d_out), lambda i: (i, 0)),
        ),
        compiler_params=pltpu.CompilerParams(
            dimension_semantics=("parallel",),
            vmem_limit_bytes=int(vmem_limit),
        ),
    )(x, w1_t, scale2d, b1_2d, w2_t, b2_2d)

    return y


def reference_forward(x, w1, b1, gamma, beta, running_mean, running_var, eps, w2, b2):
    h = x @ w1.T + b1
    h = (h - running_mean) / jnp.sqrt(running_var + eps) * gamma + beta
    h = jnp.where(h >= 0, h, 0.2 * h)
    return h @ w2.T + b2


def _make_problem(key, n, d_in, d_out, nontrivial_stats):
    kx, kw1, kb1, kg, kbt, km, kv, kw2, kb2 = jax.random.split(key, 9)
    bound1 = 1.0 / (d_in ** 0.5)
    w1 = jax.random.uniform(kw1, (d_in, d_in), jnp.float32, -bound1, bound1)   # (out, in)
    b1 = jax.random.uniform(kb1, (d_in,), jnp.float32, -bound1, bound1)
    w2 = jax.random.uniform(kw2, (d_out, d_in), jnp.float32, -bound1, bound1)  # (out, in)
    b2 = jax.random.uniform(kb2, (d_out,), jnp.float32, -bound1, bound1)
    gamma = 1.0 + 0.1 * jax.random.normal(kg, (d_in,), jnp.float32)
    beta = 0.1 * jax.random.normal(kbt, (d_in,), jnp.float32)
    if nontrivial_stats:
        running_mean = 0.2 * jax.random.normal(km, (d_in,), jnp.float32)
        running_var = 1.0 + 0.3 * jax.random.uniform(kv, (d_in,), jnp.float32)
    else:
        running_mean = jnp.zeros((d_in,), jnp.float32)
        running_var = jnp.ones((d_in,), jnp.float32)
    x = jax.random.normal(kx, (n, d_in), jnp.float32)
    return x, w1, b1, gamma, beta, running_mean, running_var, w2, b2


if __name__ == "__main__":
    eps = 1e-5

    # Test 1: the module's small shapes (input_dim=32, out_dim=16, batch=8).
    key = jax.random.PRNGKey(0)
    k1, k2 = jax.random.split(key)
    x, w1, b1, gamma, beta, rm, rv, w2, b2 = _make_problem(k1, 8, 32, 16, False)
    y = oracle_forward(x, w1, b1, gamma, beta, rm, rv, eps, w2, b2)
    y = jax.block_until_ready(y)
    y_ref = reference_forward(x, w1, b1, gamma, beta, rm, rv, eps, w2, b2)
    assert y.shape == (8, 16)
    assert jnp.allclose(y, y_ref, atol=2e-2, rtol=2e-2)

    # Test 2: non-128 feature dims, ragged batch (cdiv grid tail), non-trivial BN stats.
    x2, w1b, b1b, g2, bt2, rm2, rv2, w2b, b2b = _make_problem(k2, 600, 96, 40, True)
    y2 = oracle_forward(x2, w1b, b1b, g2, bt2, rm2, rv2, eps, w2b, b2b)
    y2 = jax.block_until_ready(y2)
    y2_ref = reference_forward(x2, w1b, b1b, g2, bt2, rm2, rv2, eps, w2b, b2b)
    assert y2.shape == (600, 40)
    assert jnp.allclose(y2, y2_ref, atol=2e-2, rtol=2e-2)

    print("KERNEL_OK")
</pallas_src>

<mosaic_0001>
module attributes {stable_mosaic.version = 11 : i64} {
  func.func @oracle_kernel(%arg0: i32, %arg1: memref<8x32xf32, #tpu.memory_space<vmem>>, %arg2: memref<32x32xbf16, #tpu.memory_space<vmem>>, %arg3: memref<1x32xf32, #tpu.memory_space<vmem>>, %arg4: memref<1x32xf32, #tpu.memory_space<vmem>>, %arg5: memref<32x16xbf16, #tpu.memory_space<vmem>>, %arg6: memref<1x16xf32, #tpu.memory_space<vmem>>, %arg7: memref<8x16xbf16, #tpu.memory_space<vmem>>) attributes {dimension_semantics = [#tpu.dimension_semantics<parallel>], iteration_bounds = array<i64: 1>, scalar_prefetch = 0 : i64, scratch_operands = 0 : i64, tpu.core_type = #tpu.core_type<tc>, window_params = [{transform_indices = @transform_0, window_bounds = array<i64: 8, 32>}, {pipeline_mode = #tpu.pipeline_mode<synchronous>, transform_indices = @transform_1, window_bounds = array<i64: 32, 32>}, {pipeline_mode = #tpu.pipeline_mode<synchronous>, transform_indices = @transform_2, window_bounds = array<i64: 1, 32>}, {pipeline_mode = #tpu.pipeline_mode<synchronous>, transform_indices = @transform_3, window_bounds = array<i64: 1, 32>}, {pipeline_mode = #tpu.pipeline_mode<synchronous>, transform_indices = @transform_4, window_bounds = array<i64: 32, 16>}, {pipeline_mode = #tpu.pipeline_mode<synchronous>, transform_indices = @transform_5, window_bounds = array<i64: 1, 16>}, {transform_indices = @transform_6, window_bounds = array<i64: 8, 16>}]} {
    %c0 = arith.constant 0 : index
    %c0_0 = arith.constant 0 : index
    %0 = vector.load %arg1[%c0, %c0_0] : memref<8x32xf32, #tpu.memory_space<vmem>>, vector<8x32xf32>
    %1 = arith.truncf %0 : vector<8x32xf32> to vector<8x32xbf16>
    %c0_1 = arith.constant 0 : index
    %c0_2 = arith.constant 0 : index
    %2 = vector.load %arg2[%c0_1, %c0_2] : memref<32x32xbf16, #tpu.memory_space<vmem>>, vector<32x32xbf16>
    %cst = arith.constant dense<0.000000e+00> : vector<8x32xf32>
    %3 = tpu.matmul %1, %2, %cst {dimension_numbers = #tpu.dot_dimension_numbers<[1], [0], [0], [1], [0, 0, 1, 1], [], []>} : vector<8x32xbf16>, vector<32x32xbf16>, vector<8x32xf32> -> vector<8x32xf32>
    %c0_3 = arith.constant 0 : index
    %c0_4 = arith.constant 0 : index
    %4 = vector.load %arg3[%c0_3, %c0_4] : memref<1x32xf32, #tpu.memory_space<vmem>>, vector<1x32xf32>
    %5 = vector.broadcast %4 : vector<1x32xf32> to vector<8x32xf32>
    %6 = arith.mulf %3, %5 : vector<8x32xf32>
    %c0_5 = arith.constant 0 : index
    %c0_6 = arith.constant 0 : index
    %7 = vector.load %arg4[%c0_5, %c0_6] : memref<1x32xf32, #tpu.memory_space<vmem>>, vector<1x32xf32>
    %8 = vector.broadcast %7 : vector<1x32xf32> to vector<8x32xf32>
    %9 = arith.addf %6, %8 : vector<8x32xf32>
    %cst_7 = arith.constant 0.000000e+00 : f32
    %10 = vector.broadcast %cst_7 : f32 to vector<8x32xf32>
    %11 = arith.cmpf oge, %9, %10 : vector<8x32xf32>
    %cst_8 = arith.constant 2.000000e-01 : f32
    %12 = vector.broadcast %cst_8 : f32 to vector<8x32xf32>
    %13 = arith.mulf %12, %9 : vector<8x32xf32>
    %14 = arith.select %11, %9, %13 : vector<8x32xi1>, vector<8x32xf32>
    %15 = arith.truncf %14 : vector<8x32xf32> to vector<8x32xbf16>
    %c0_9 = arith.constant 0 : index
    %c0_10 = arith.constant 0 : index
    %16 = vector.load %arg5[%c0_9, %c0_10] : memref<32x16xbf16, #tpu.memory_space<vmem>>, vector<32x16xbf16>
    %cst_11 = arith.constant dense<0.000000e+00> : vector<8x16xf32>
    %17 = tpu.matmul %15, %16, %cst_11 {dimension_numbers = #tpu.dot_dimension_numbers<[1], [0], [0], [1], [0, 0, 1, 1], [], []>} : vector<8x32xbf16>, vector<32x16xbf16>, vector<8x16xf32> -> vector<8x16xf32>
    %c0_12 = arith.constant 0 : index
    %c0_13 = arith.constant 0 : index
    %18 = vector.load %arg6[%c0_12, %c0_13] : memref<1x16xf32, #tpu.memory_space<vmem>>, vector<1x16xf32>
    %19 = vector.broadcast %18 : vector<1x16xf32> to vector<8x16xf32>
    %20 = arith.addf %17, %19 : vector<8x16xf32>
    %21 = arith.truncf %20 : vector<8x16xf32> to vector<8x16xbf16>
    %c0_14 = arith.constant 0 : index
    %c0_15 = arith.constant 0 : index
    %22 = vector.load %arg7[%c0_14, %c0_15] : memref<8x16xbf16, #tpu.memory_space<vmem>>, vector<8x16xbf16>
    tpu.vector_store %arg7[%c0_14, %c0_15], %21 {strides = array<i32>} : memref<8x16xbf16, #tpu.memory_space<vmem>>, vector<8x16xbf16>,
    return
  }
  func.func @transform_0(%arg0: i32) -> (i32, i32) {
    %c0_i32 = arith.constant 0 : i32
    %c0_i32_0 = arith.constant 0 : i32
    return %arg0, %c0_i32 : i32, i32
  }
  func.func @transform_1(%arg0: i32) -> (i32, i32) {
    %c0_i32 = arith.constant 0 : i32
    %c0_i32_0 = arith.constant 0 : i32
    %c0_i32_1 = arith.constant 0 : i32
    return %c0_i32, %c0_i32_0 : i32, i32
  }
  func.func @transform_2(%arg0: i32) -> (i32, i32) {
    %c0_i32 = arith.constant 0 : i32
    %c0_i32_0 = arith.constant 0 : i32
    %c0_i32_1 = arith.constant 0 : i32
    return %c0_i32, %c0_i32_0 : i32, i32
  }
  func.func @transform_3(%arg0: i32) -> (i32, i32) {
    %c0_i32 = arith.constant 0 : i32
    %c0_i32_0 = arith.constant 0 : i32
    %c0_i32_1 = arith.constant 0 : i32
    return %c0_i32, %c0_i32_0 : i32, i32
  }
  func.func @transform_4(%arg0: i32) -> (i32, i32) {
    %c0_i32 = arith.constant 0 : i32
    %c0_i32_0 = arith.constant 0 : i32
    %c0_i32_1 = arith.constant 0 : i32
    return %c0_i32, %c0_i32_0 : i32, i32
  }
  func.func @transform_5(%arg0: i32) -> (i32, i32) {
    %c0_i32 = arith.constant 0 : i32
    %c0_i32_0 = arith.constant 0 : i32
    %c0_i32_1 = arith.constant 0 : i32
    return %c0_i32, %c0_i32_0 : i32, i32
  }
  func.func @transform_6(%arg0: i32) -> (i32, i32) {
    %c0_i32 = arith.constant 0 : i32
    %c0_i32_0 = arith.constant 0 : i32
    return %arg0, %c0_i32 : i32, i32
  }
}

</mosaic_0001>

<bundles_post_ra>
// kernel: oracle_forward.1
= control target key start
LH: loop header
LB: loop body
LE: loop exit
PB: predicated region body
PF: predicated region fallthrough
CT: control target
= control target key end

     0   :  { %s246_s0 = inlined_call_operand.vmem [shape: f32[8,32], index: 0, kind: input, shape index: {}]   ;;  %s247_s1 = inlined_call_operand.vmem [shape: bf16[32,32], index: 1, kind: input, shape index: {}]   ;;  %s248_s2 = inlined_call_operand.vmem [shape: f32[1,32], index: 2, kind: input, shape index: {}]   ;;  %s249_s3 = inlined_call_operand.vmem [shape: f32[1,32], index: 3, kind: input, shape index: {}]   ;;  %s250_s4 = inlined_call_operand.vmem [shape: bf16[32,16], index: 4, kind: input, shape index: {}]   ;;  %s251_s5 = inlined_call_operand.vmem [shape: f32[1,16], index: 5, kind: input, shape index: {}]   ;;  %s252_s6 = inlined_call_operand.hbm [shape: bf16[8,16], index: 6, kind: output, shape index: {}]  }
   0x1   :  { %v148_v0 = vld [vmem:[%s247_s1 + $0x8] sm:$0xff]  ;;  %v147_v1 = vld [vmem:[%s247_s1] sm:$0xff] }
   0x2   :  { %53 = vmatpush.bf16.msra.mxu0 %v148_v0  ;;  %v25_v2 = vld [vmem:[%s246_s0] sm:$0xff] }
   0x3   :  { %11 = vsyncpa [#allocation3], 0  ;;  %v26_v3 = vpack.c.bf16 %v25_v2, %v25_v2  ;;  %vm43_vm0 = vcmask 261120   ;;  %v150_v4 = vld [vmem:[%s250_s4 + $0x8] sm:$0xff]  ;;  %v149_v5 = vld [vmem:[%s250_s4] sm:$0xff]  ;;  %vm111_vm2 = vcmask 125952  }
   0x4   :  { %103 = vmatpush.bf16.msra.mxu1 %v150_v4  ;;  %v152_v6 = vld [vmem:[%s248_s2] ss:$0 sm:$0xff]  ;;  %s181_s2 = smov [#allocation2]  }
   0x5   :  { %v153_v7 = vld [vmem:[%s249_s3] ss:$0 sm:$0xff]  ;;  %s118_s10 = sshll.u32 %s181_s2, 4  ;;  %s120_s3 = sshll.u32 %s252_s6, 4  ;;  %s119_s10 = int_to_ptr.vmem [resolvable:$true] %s118_s10  ;;  %s121_s3 = int_to_ptr.hbm [resolvable:$true] %s120_s3 }
   0x6   :  { %54 = vmatpush.bf16.msra.mxu0 %v147_v1  ;;  %v154_v15 = vld [vmem:[%s251_s5] ss:$0 sm:$0xff] }
   0x8   :  { %104 = vmatpush.bf16.msra.mxu1 %v149_v5 }
   0x9   :  { %137 = vmatmul.msk.bf16.vlgmr.msra.gmra.mxu0 %vm43_vm0, %v26_v3 }
  0x86   :  { %v56_v8 = vpop.f32.mrf.mxu0 }
  0x87   :  { %v64_v9 = vmul.f32 %v152_v6, %v56_v8 }
  0x89   :  { %v69_v10 = vadd.f32 %v153_v7, %v64_v9 }
  0x8b   :  { %v71_v11 = vmul.f32 0.2, %v69_v10  ;;  %vm70_vm1 = vcmp.ge.f32.partialorder %v69_v10, 0.0 }
  0x8d   :  { %v72_v12 = vsel %vm70_vm1, %v69_v10, %v71_v11 }
  0x8e   :  { %v58_v13 = vpop.f32.mrf.mxu0  ;;  %v73_v14 = vpack.c.bf16 %v72_v12, %v72_v12 }
  0x90   :  { %146 = vmatmul.msk.bf16.vlgmr.msra.gmra.mxu1 %vm43_vm0, %v73_v14 }
 0x10d   :  { %v106_v16 = vpop.f32.mrf.mxu1 }
 0x10e   :  { %v107_v17 = vadd.f32 %v154_v15, %v106_v16 }
 0x110   :  { %v110_v18 = vpack.c.bf16 %v107_v17, %v107_v17 }
 0x112   :  { %112 = vst.msk [vmem:[#allocation2] sm:$0xf] %vm111_vm2, %v110_v18 }
 0x113   :  { %123 = dma.vmem_to_hbm [thread:$0]  %s119_s10, 64, %s121_s3, [#allocation3]  }
 0x115   :  { %v108_v19 = vpop.f32.mrf.mxu1 }
 0x116   :  { %179 = dma.done.wait [#allocation3], 64  }
 0x117   :  { %180 = vsyncadd [#allocation3], 4294967232 }
 0x118   :  { %128 = vsyncpa [#allocation3], 1 }

</bundles_post_ra>
